<compile_context>
chip_gen: v6e
topology: v6e:2x2x1
jax: 0.10.0
libtpu: 0.0.40
codegen_flags: <defaults>
</compile_context>

<pallas_src>
import functools

import jax
import jax.numpy as jnp
from jax import lax
from jax.experimental import pallas as pl
from jax.experimental.pallas import tpu as pltpu

BN_EPS = 1e-5


def _round_up(n, m):
    return ((n + m - 1) // m) * m


# ---------------------------------------------------------------------------
# Kernels
# ---------------------------------------------------------------------------
def _eval_kernel(x_ref, w1_ref, b1_ref, w2_ref, b2_ref, w3_ref, b3_ref, o_ref):
    """Eval mode: BN (running stats) pre-folded into the weights, dropout is
    identity.  bf16 MXU matmuls with f32 accumulation; elementwise in f32."""
    x = x_ref[...].astype(jnp.bfloat16)
    h = jnp.dot(x, w1_ref[...], preferred_element_type=jnp.float32) + b1_ref[...]
    h = jnp.maximum(h, 0.0)

    h = jnp.dot(h.astype(jnp.bfloat16), w2_ref[...],
                preferred_element_type=jnp.float32) + b2_ref[...]
    h = jnp.maximum(h, 0.0)

    # output layer (N=1): keep it off the MXU -- VPU multiply + lane reduce,
    # then store a lane-dense (1, TB) row instead of a 1-lane column.
    out = jnp.sum(h * w3_ref[...], axis=-1, keepdims=True) + b3_ref[...]   # (TB, 1)
    o_ref[...] = jnp.transpose(out)[None].astype(o_ref.dtype)             # (1, 1, TB)


def _train_kernel(x_ref, mask_ref,
                  w1_ref, b1_ref, g1_ref, be1_ref,
                  w2_ref, b2_ref, g2_ref, be2_ref,
                  w3_ref, b3_ref, o_ref, *, b_valid):
    """Train mode: BN uses batch statistics over the real (unpadded) rows,
    inverted dropout via a pre-scaled mask input."""
    rows = lax.broadcasted_iota(jnp.int32, (x_ref.shape[0], 1), 0)
    valid = (rows < b_valid).astype(jnp.float32)                 # (TB, 1)
    inv_b = 1.0 / float(b_valid)

    def batchnorm(h, g, be):
        mu = jnp.sum(h * valid, axis=0, keepdims=True) * inv_b
        c = h - mu                                               # reuse centered tensor
        var = jnp.sum((c * c) * valid, axis=0, keepdims=True) * inv_b
        return c * lax.rsqrt(var + BN_EPS) * g + be

    x = x_ref[...].astype(jnp.bfloat16)
    h = jnp.dot(x, w1_ref[...], preferred_element_type=jnp.float32) + b1_ref[...]
    h = jnp.maximum(h, 0.0)
    h = batchnorm(h, g1_ref[...], be1_ref[...])

    h = jnp.dot(h.astype(jnp.bfloat16), w2_ref[...],
                preferred_element_type=jnp.float32) + b2_ref[...]
    h = jnp.maximum(h, 0.0)
    h = batchnorm(h, g2_ref[...], be2_ref[...])

    # inverted dropout: mask is pre-scaled to {0, 1/(1-p)} (single multiply)
    h = h * mask_ref[...]

    out = jnp.sum(h * w3_ref[...], axis=-1, keepdims=True) + b3_ref[...]   # (TB, 1)
    o_ref[...] = jnp.transpose(out)[None].astype(o_ref.dtype)             # (1, 1, TB)


# ---------------------------------------------------------------------------
# Wrapper
# ---------------------------------------------------------------------------
def _fold_bn_eval(params):
    """Fold eval-mode BatchNorm (running stats) into the adjacent Linear
    layers and cast MXU operands to bf16.  Pure JAX; under jit with constant
    params this folds into the weights once instead of per step."""
    w2, b2 = params["w2"], params["b2"]
    w3, b3 = params["w3"], params["b3"]                  # w3 stored as (1, H) row

    s1 = params["gamma1"] * lax.rsqrt(params["rv1"] + BN_EPS)    # (1, H)
    t1 = params["beta1"] - params["rm1"] * s1
    s2 = params["gamma2"] * lax.rsqrt(params["rv2"] + BN_EPS)
    t2 = params["beta2"] - params["rm2"] * s2

    w2f = w2 * jnp.transpose(s1)                         # scale W2 rows by BN1 scale
    b2f = b2 + t1 @ w2                                   # fold BN1 shift into b2
    w3f = w3 * s2                                        # fold BN2 scale into w3 row
    b3f = b3 + jnp.sum(t2 * w3)                          # fold BN2 shift into b3

    return dict(w1=params["w1"].astype(jnp.bfloat16), b1=params["b1"],
                w2=w2f.astype(jnp.bfloat16), b2=b2f,
                w3=w3f, b3=b3f)


def neuralnette_forward(x, params, *, training=False, p_drop=0.1,
                        dropout_key=None, max_batch_tile=1024):
    """x: (B, input_size) f32.  params: dict from init_params (unpadded)."""
    x = x.astype(jnp.float32)
    B, D = x.shape
    H = params["w1"].shape[1]

    B8 = _round_up(B, 8)
    if training:
        # BN batch statistics need the whole batch resident -> single tile.
        nb, TB = 1, B8
    else:
        # balanced batch tiles: at most 7 rows of padding total.
        nb = max(1, pl.cdiv(B8, max_batch_tile))
        TB = _round_up(pl.cdiv(B8, nb), 8)
    B_pad = nb * TB

    # Pad the batch dim only; feature dims stay unpadded (full-extent blocks
    # satisfy the (8,128) rule, Mosaic masks ragged lanes in-vreg).
    xp = jnp.pad(x, ((0, B_pad - B), (0, 0)))

    def full(a):
        nd = a.ndim
        return pl.BlockSpec(a.shape, lambda i, _nd=nd: (0,) * _nd)

    x_spec = pl.BlockSpec((TB, D), lambda i: (i, 0))
    out_shape = jax.ShapeDtypeStruct((nb, 1, TB), jnp.float32)
    out_spec = pl.BlockSpec((1, 1, TB), lambda i: (i, 0, 0))

    if training:
        if p_drop > 0.0:
            if dropout_key is None:
                dropout_key = jax.random.PRNGKey(0)
            keep = jax.random.bernoulli(dropout_key, 1.0 - p_drop, (B_pad, H))
            mask = jnp.where(keep, 1.0 / (1.0 - p_drop), 0.0).astype(jnp.float32)
        else:
            mask = jnp.ones((B_pad, H), jnp.float32)
        args = (xp, mask,
                params["w1"].astype(jnp.bfloat16), params["b1"],
                params["gamma1"], params["beta1"],
                params["w2"].astype(jnp.bfloat16), params["b2"],
                params["gamma2"], params["beta2"],
                params["w3"], params["b3"])
        kernel = functools.partial(_train_kernel, b_valid=B)
        in_specs = ([x_spec, pl.BlockSpec((TB, H), lambda i: (i, 0))]
                    + [full(a) for a in args[2:]])
        dims = ("arbitrary",)
    else:
        fp = _fold_bn_eval(params)
        args = (xp, fp["w1"], fp["b1"], fp["w2"], fp["b2"], fp["w3"], fp["b3"])
        kernel = _eval_kernel
        in_specs = [x_spec] + [full(a) for a in args[1:]]
        dims = ("parallel",)   # batch tiles shard across v7x TensorCores

    out = pl.pallas_call(
        kernel,
        out_shape=out_shape,
        grid=(nb,),
        in_specs=in_specs,
        out_specs=out_spec,
        compiler_params=pltpu.CompilerParams(dimension_semantics=dims),
    )(*args)

    return out.reshape(-1)[:B].reshape(B, 1)


# ---------------------------------------------------------------------------
# Params init (mimics torch.nn.Linear Kaiming-uniform bounds)
# ---------------------------------------------------------------------------
def init_params(key, input_size, hidden_size):
    """Linear weights stored transposed: (in_features, out_features); the
    output-layer weight is stored as a (1, hidden_size) row for the VPU path."""
    ks = jax.random.split(key, 10)

    def linear(kw, kb, fan_in, fan_out):
        bound = 1.0 / (float(fan_in) ** 0.5)
        w = jax.random.uniform(kw, (fan_in, fan_out), jnp.float32, -bound, bound)
        b = jax.random.uniform(kb, (1, fan_out), jnp.float32, -bound, bound)
        return w, b

    w1, b1 = linear(ks[0], ks[1], input_size, hidden_size)
    w2, b2 = linear(ks[2], ks[3], hidden_size, hidden_size)
    w3c, b3 = linear(ks[4], ks[5], hidden_size, 1)
    return {
        "w1": w1, "b1": b1,
        "w2": w2, "b2": b2,
        "w3": jnp.transpose(w3c), "b3": b3,           # w3 as (1, H) row
        "gamma1": jnp.ones((1, hidden_size), jnp.float32),
        "beta1": jnp.zeros((1, hidden_size), jnp.float32),
        "gamma2": jnp.ones((1, hidden_size), jnp.float32),
        "beta2": jnp.zeros((1, hidden_size), jnp.float32),
        # Non-trivial "running" stats so eval-mode BN is actually exercised.
        "rm1": 0.1 * jax.random.normal(ks[6], (1, hidden_size), jnp.float32),
        "rv1": jax.random.uniform(ks[7], (1, hidden_size), jnp.float32, 0.5, 1.5),
        "rm2": 0.1 * jax.random.normal(ks[8], (1, hidden_size), jnp.float32),
        "rv2": jax.random.uniform(ks[9], (1, hidden_size), jnp.float32, 0.5, 1.5),
    }


def _reference(x, p, training=False, matmul_dtype=jnp.float32):
    """Pure-JAX reference (dropout excluded / identity).  matmul_dtype lets us
    compare against the same bf16-operand matmuls the kernel uses."""
    def mm(a, w):
        return jnp.dot(a.astype(matmul_dtype), w.astype(matmul_dtype),
                       preferred_element_type=jnp.float32)

    def bn(h, g, b, rm, rv):
        if training:
            mu = h.mean(0, keepdims=True)
            var = ((h - mu) ** 2).mean(0, keepdims=True)
        else:
            mu, var = rm, rv
        return (h - mu) / jnp.sqrt(var + BN_EPS) * g + b

    h = jnp.maximum(mm(x, p["w1"]) + p["b1"], 0.0)
    h = bn(h, p["gamma1"], p["beta1"], p["rm1"], p["rv1"])
    h = jnp.maximum(mm(h, p["w2"]) + p["b2"], 0.0)
    h = bn(h, p["gamma2"], p["beta2"], p["rm2"], p["rv2"])
    return h @ jnp.transpose(p["w3"]) + p["b3"]          # output layer in f32


if __name__ == "__main__":
    INPUT_SIZE = 16
    HIDDEN_SIZE = 32
    BATCH = 8

    key = jax.random.PRNGKey(0)
    k_x, k_p, k_do = jax.random.split(key, 3)
    x = jax.random.normal(k_x, (BATCH, INPUT_SIZE), jnp.float32)
    params = init_params(k_p, INPUT_SIZE, HIDDEN_SIZE)

    # 1) eval mode (model.eval(): BN running stats, dropout identity).
    out_eval = jax.block_until_ready(neuralnette_forward(x, params, training=False))
    ref_eval = _reference(x, params, training=False, matmul_dtype=jnp.bfloat16)
    assert out_eval.shape == (BATCH, 1)
    assert jnp.allclose(out_eval, ref_eval, atol=2e-2, rtol=2e-2), "eval mismatch"

    # 2) train mode, p_drop=0 (BN batch statistics, no dropout): deterministic parity.
    out_tr = jax.block_until_ready(
        neuralnette_forward(x, params, training=True, p_drop=0.0))
    ref_tr = _reference(x, params, training=True, matmul_dtype=jnp.bfloat16)
    assert jnp.allclose(out_tr, ref_tr, atol=2e-2, rtol=2e-2), "train mismatch"

    # 3) train mode with real dropout (p=0.1): mask comes from jax.random, so the
    #    RNG stream differs from torch; sanity-check shape/finiteness only.
    out_do = jax.block_until_ready(
        neuralnette_forward(x, params, training=True, p_drop=0.1, dropout_key=k_do))
    assert out_do.shape == (BATCH, 1)
    assert bool(jnp.all(jnp.isfinite(out_do)))

    print("KERNEL_OK")
</pallas_src>

<mosaic_0001>
module attributes {stable_mosaic.version = 11 : i64} {
  func.func @_eval_kernel(%arg0: i32, %arg1: memref<8x16xf32, #tpu.memory_space<vmem>>, %arg2: memref<16x32xbf16, #tpu.memory_space<vmem>>, %arg3: memref<1x32xf32, #tpu.memory_space<vmem>>, %arg4: memref<32x32xbf16, #tpu.memory_space<vmem>>, %arg5: memref<1x32xf32, #tpu.memory_space<vmem>>, %arg6: memref<1x32xf32, #tpu.memory_space<vmem>>, %arg7: memref<1x1xf32, #tpu.memory_space<vmem>>, %arg8: memref<1x1x8xf32, #tpu.memory_space<vmem>>) attributes {dimension_semantics = [#tpu.dimension_semantics<parallel>], iteration_bounds = array<i64: 1>, scalar_prefetch = 0 : i64, scratch_operands = 0 : i64, tpu.core_type = #tpu.core_type<tc>, window_params = [{transform_indices = @transform_0, window_bounds = array<i64: 8, 16>}, {pipeline_mode = #tpu.pipeline_mode<synchronous>, transform_indices = @transform_1, window_bounds = array<i64: 16, 32>}, {pipeline_mode = #tpu.pipeline_mode<synchronous>, transform_indices = @transform_2, window_bounds = array<i64: 1, 32>}, {pipeline_mode = #tpu.pipeline_mode<synchronous>, transform_indices = @transform_3, window_bounds = array<i64: 32, 32>}, {pipeline_mode = #tpu.pipeline_mode<synchronous>, transform_indices = @transform_4, window_bounds = array<i64: 1, 32>}, {pipeline_mode = #tpu.pipeline_mode<synchronous>, transform_indices = @transform_5, window_bounds = array<i64: 1, 32>}, {pipeline_mode = #tpu.pipeline_mode<synchronous>, transform_indices = @transform_6, window_bounds = array<i64: 1, 1>}, {transform_indices = @transform_7, window_bounds = array<i64: 1, 1, 8>}]} {
    %c0 = arith.constant 0 : index
    %c0_0 = arith.constant 0 : index
    %0 = vector.load %arg1[%c0, %c0_0] : memref<8x16xf32, #tpu.memory_space<vmem>>, vector<8x16xf32>
    %1 = arith.truncf %0 : vector<8x16xf32> to vector<8x16xbf16>
    %c0_1 = arith.constant 0 : index
    %c0_2 = arith.constant 0 : index
    %2 = vector.load %arg2[%c0_1, %c0_2] : memref<16x32xbf16, #tpu.memory_space<vmem>>, vector<16x32xbf16>
    %cst = arith.constant dense<0.000000e+00> : vector<8x32xf32>
    %3 = tpu.matmul %1, %2, %cst {dimension_numbers = #tpu.dot_dimension_numbers<[1], [0], [0], [1], [0, 0, 1, 1], [], []>} : vector<8x16xbf16>, vector<16x32xbf16>, vector<8x32xf32> -> vector<8x32xf32>
    %c0_3 = arith.constant 0 : index
    %c0_4 = arith.constant 0 : index
    %4 = vector.load %arg3[%c0_3, %c0_4] : memref<1x32xf32, #tpu.memory_space<vmem>>, vector<1x32xf32>
    %5 = vector.broadcast %4 : vector<1x32xf32> to vector<8x32xf32>
    %6 = arith.addf %3, %5 : vector<8x32xf32>
    %cst_5 = arith.constant 0.000000e+00 : f32
    %7 = vector.broadcast %cst_5 : f32 to vector<8x32xf32>
    %8 = arith.maximumf %6, %7 : vector<8x32xf32>
    %9 = arith.truncf %8 : vector<8x32xf32> to vector<8x32xbf16>
    %c0_6 = arith.constant 0 : index
    %c0_7 = arith.constant 0 : index
    %10 = vector.load %arg4[%c0_6, %c0_7] : memref<32x32xbf16, #tpu.memory_space<vmem>>, vector<32x32xbf16>
    %cst_8 = arith.constant dense<0.000000e+00> : vector<8x32xf32>
    %11 = tpu.matmul %9, %10, %cst_8 {dimension_numbers = #tpu.dot_dimension_numbers<[1], [0], [0], [1], [0, 0, 1, 1], [], []>} : vector<8x32xbf16>, vector<32x32xbf16>, vector<8x32xf32> -> vector<8x32xf32>
    %c0_9 = arith.constant 0 : index
    %c0_10 = arith.constant 0 : index
    %12 = vector.load %arg5[%c0_9, %c0_10] : memref<1x32xf32, #tpu.memory_space<vmem>>, vector<1x32xf32>
    %13 = vector.broadcast %12 : vector<1x32xf32> to vector<8x32xf32>
    %14 = arith.addf %11, %13 : vector<8x32xf32>
    %cst_11 = arith.constant 0.000000e+00 : f32
    %15 = vector.broadcast %cst_11 : f32 to vector<8x32xf32>
    %16 = arith.maximumf %14, %15 : vector<8x32xf32>
    %c0_12 = arith.constant 0 : index
    %c0_13 = arith.constant 0 : index
    %17 = vector.load %arg6[%c0_12, %c0_13] : memref<1x32xf32, #tpu.memory_space<vmem>>, vector<1x32xf32>
    %18 = vector.broadcast %17 : vector<1x32xf32> to vector<8x32xf32>
    %19 = arith.mulf %16, %18 : vector<8x32xf32>
    %cst_14 = arith.constant dense<0.000000e+00> : vector<8xf32>
    %20 = vector.multi_reduction <add>, %19, %cst_14 [1] : vector<8x32xf32> to vector<8xf32>
    %21 = vector.shape_cast %20 : vector<8xf32> to vector<8x1xf32>
    %c0_15 = arith.constant 0 : index
    %c0_16 = arith.constant 0 : index
    %22 = vector.load %arg7[%c0_15, %c0_16] : memref<1x1xf32, #tpu.memory_space<vmem>>, vector<1x1xf32>
    %23 = vector.broadcast %22 : vector<1x1xf32> to vector<8x1xf32>
    %24 = arith.addf %21, %23 : vector<8x1xf32>
    %25 = tpu.transpose %24, [1, 0] : vector<8x1xf32> -> vector<1x8xf32>
    %26 = vector.shape_cast %25 : vector<1x8xf32> to vector<1x1x8xf32>
    %c0_17 = arith.constant 0 : index
    %c0_18 = arith.constant 0 : index
    %c0_19 = arith.constant 0 : index
    %27 = vector.load %arg8[%c0_17, %c0_18, %c0_19] : memref<1x1x8xf32, #tpu.memory_space<vmem>>, vector<1x1x8xf32>
    tpu.vector_store %arg8[%c0_17, %c0_18, %c0_19], %26 {strides = array<i32>} : memref<1x1x8xf32, #tpu.memory_space<vmem>>, vector<1x1x8xf32>,
    return
  }
  func.func @transform_0(%arg0: i32) -> (i32, i32) {
    %c0_i32 = arith.constant 0 : i32
    %c0_i32_0 = arith.constant 0 : i32
    return %arg0, %c0_i32 : i32, i32
  }
  func.func @transform_1(%arg0: i32) -> (i32, i32) {
    %c0_i32 = arith.constant 0 : i32
    %c0_i32_0 = arith.constant 0 : i32
    %c0_i32_1 = arith.constant 0 : i32
    return %c0_i32, %c0_i32_0 : i32, i32
  }
  func.func @transform_2(%arg0: i32) -> (i32, i32) {
    %c0_i32 = arith.constant 0 : i32
    %c0_i32_0 = arith.constant 0 : i32
    %c0_i32_1 = arith.constant 0 : i32
    return %c0_i32, %c0_i32_0 : i32, i32
  }
  func.func @transform_3(%arg0: i32) -> (i32, i32) {
    %c0_i32 = arith.constant 0 : i32
    %c0_i32_0 = arith.constant 0 : i32
    %c0_i32_1 = arith.constant 0 : i32
    return %c0_i32, %c0_i32_0 : i32, i32
  }
  func.func @transform_4(%arg0: i32) -> (i32, i32) {
    %c0_i32 = arith.constant 0 : i32
    %c0_i32_0 = arith.constant 0 : i32
    %c0_i32_1 = arith.constant 0 : i32
    return %c0_i32, %c0_i32_0 : i32, i32
  }
  func.func @transform_5(%arg0: i32) -> (i32, i32) {
    %c0_i32 = arith.constant 0 : i32
    %c0_i32_0 = arith.constant 0 : i32
    %c0_i32_1 = arith.constant 0 : i32
    return %c0_i32, %c0_i32_0 : i32, i32
  }
  func.func @transform_6(%arg0: i32) -> (i32, i32) {
    %c0_i32 = arith.constant 0 : i32
    %c0_i32_0 = arith.constant 0 : i32
    %c0_i32_1 = arith.constant 0 : i32
    return %c0_i32, %c0_i32_0 : i32, i32
  }
  func.func @transform_7(%arg0: i32) -> (i32, i32, i32) {
    %c0_i32 = arith.constant 0 : i32
    %c0_i32_0 = arith.constant 0 : i32
    %c0_i32_1 = arith.constant 0 : i32
    return %arg0, %c0_i32, %c0_i32_0 : i32, i32, i32
  }
}

</mosaic_0001>

<bundles_post_ra>
// kernel: tpu_custom_call.1
= control target key start
LH: loop header
LB: loop body
LE: loop exit
PB: predicated region body
PF: predicated region fallthrough
CT: control target
= control target key end

     0   :  { %s466_s0 = inlined_call_operand.hbm [shape: f32[8,16], index: 0, kind: input, shape index: {}]   ;;  %s467_s1 = inlined_call_operand.hbm [shape: bf16[16,32], index: 1, kind: input, shape index: {}]   ;;  %s468_s2 = inlined_call_operand.vmem [shape: f32[1,32], index: 2, kind: input, shape index: {}]   ;;  %s469_s3 = inlined_call_operand.hbm [shape: bf16[32,32], index: 3, kind: input, shape index: {}]   ;;  %s470_s4 = inlined_call_operand.vmem [shape: f32[1,32], index: 4, kind: input, shape index: {}]   ;;  %s471_s5 = inlined_call_operand.vmem [shape: f32[1,32], index: 5, kind: input, shape index: {}]   ;;  %s472_s6 = inlined_call_operand.<no memory space> [shape: f32[1,1], index: 6, kind: input, shape index: {}]   ;;  %s473_s7 = inlined_call_operand.hbm [shape: f32[1,1,8], index: 7, kind: output, shape index: {}]  }
   0x1   :  { %v12_v0 = vstv %s472_s6 }
   0x2   :  { %13 = vst [vmem:[#allocation2] sm:$0x1] %v12_v0 }
   0x3   :  { %14 = vsyncpa [#allocation4], 0 }
   0x4   :  { %15 = vsyncpa [#allocation7], 0 }
   0x5   :  { %16 = vsyncpa [#allocation5], 0  ;;  %s394_s26 = smov [#allocation6]  }
   0x6   :  { %s32_s27 = sshll.u32 %s394_s26, 4  ;;  %s33_s27 = int_to_ptr.vmem [resolvable:$true] %s32_s27 }
   0x7   :  { %s316_s28 = scalar_lea.vmem %s33_s27, 128  ;;  %p321_p1 = scmp.lt.s32.totalorder %s33_s27, %s33_s27 }
   0x8   :  { %p317_p0 = scmp.ne.s32.totalorder %s33_s27, %s316_s28  ;;  %p322_p2 = scmp.lt.s32.totalorder %s316_s28, %s316_s28 }
   0xa   :  { %p323_p3 = por %p322_p2, %p321_p1 }
   0xc   :  { %p324_p4 = pnand %p323_p3, %p317_p0 }
   0xe   :  { %327 = shalt.err (!%p324_p4)
}
   0xf   :  { %s395_s29 = smov 64   ;;  %s396_s30 = smov 4  }
  0x10   :  { %38 = dma.hbm_to_vmem [thread:$0]  %s467_s1, 128, %s33_s27, [#allocation7], %s395_s29, %s395_s29, %s396_s30  }
  0x11   :  { %s397_s6 = smov [#allocation3]   ;;  %s398_s11 = smov [#allocation8]  }
  0x12   :  { %s23_s10 = sshll.u32 %s397_s6, 4  ;;  %s46_s12 = sshll.u32 %s398_s11, 4  ;;  %s24_s10 = int_to_ptr.vmem [resolvable:$true] %s23_s10  ;;  %s47_s12 = int_to_ptr.vmem [resolvable:$true] %s46_s12 }
  0x13   :  { %s336_s13 = scalar_lea.vmem %s24_s10, 128  ;;  %p341_p6 = scmp.lt.s32.totalorder %s24_s10, %s24_s10 }
  0x14   :  { %p337_p5 = scmp.ne.s32.totalorder %s24_s10, %s336_s13  ;;  %p342_p7 = scmp.lt.s32.totalorder %s336_s13, %s336_s13 }
  0x16   :  { %p343_p8 = por %p342_p7, %p341_p6 }
  0x18   :  { %p344_p9 = pnand %p343_p8, %p337_p5 }
  0x1a   :  { %347 = shalt.err (!%p344_p9)
}
  0x1b   :  { %26 = dma.hbm_to_vmem [thread:$0]  %s466_s0, 128, %s24_s10, [#allocation4]  }
  0x1c   :  { %s356_s16 = scalar_lea.vmem %s47_s12, 256  ;;  %p361_p11 = scmp.lt.s32.totalorder %s47_s12, %s47_s12 }
  0x1d   :  { %p357_p10 = scmp.ne.s32.totalorder %s47_s12, %s356_s16  ;;  %p362_p12 = scmp.lt.s32.totalorder %s356_s16, %s356_s16 }
  0x1f   :  { %p363_p13 = por %p362_p12, %p361_p11 }
  0x21   :  { %p364_p0 = pnand %p363_p13, %p357_p10 }
  0x23   :  { %367 = shalt.err (!%p364_p0)
}
  0x24   :  { %52 = dma.hbm_to_vmem [thread:$0]  %s469_s3, 256, %s47_s12, [#allocation7], %s395_s29, %s395_s29, %s396_s30  }
  0x25   :  { %388 = dma.done.wait [#allocation4], 128  }
  0x26   :  { %389 = vsyncadd [#allocation4], 4294967168 }
  0x27   :  { %390 = dma.done.wait [#allocation7], 384  }
  0x28   :  { %391 = vsyncadd [#allocation7], 4294966912  ;;  %v399_v1 = vmov 0.0   ;;  %vm400_vm0 = vmmov 0   ;;  %v305_v2 = vld [vmem:[#allocation6] sm:$0xff]   ;;  %v69_v3 = vld [vmem:[#allocation3] sm:$0xff] }
  0x29   :  { %283 = vmatprep.subr.bf16.mxu0 %v399_v1  ;;  %285 = vmatprep.mubr.msk.bf16.mxu0 %vm400_vm0, %v399_v1  ;;  %vm86_vm1 = vcmask 130048   ;;  %v70_v4 = vpack.c.bf16 %v69_v3, %v69_v3  ;;  %v306_v5 = vld [vmem:[#allocation8 + $0x8] sm:$0xff]   ;;  %v307_v6 = vld [vmem:[#allocation8] sm:$0xff]   ;;  %vm155_vm2 = vcmask 261120   ;;  %vm251_vm3 = vcmask 57344  }
  0x2a   :  { %289 = vmatprep.subr.bf16.mxu1 %v399_v1  ;;  %293 = vmatprep.mubr.msk.bf16.mxu1 %vm400_vm0, %v399_v1  ;;  %v269_v7 = vld [vmem:[%s468_s2] ss:$0 sm:$0xff]  ;;  %s401_s2 = smov [#allocation9]  }
  0x2b   :  { %284 = vmatpush3.bf16.msra.mxu0 %v305_v2  ;;  %290 = vmatpush3.bf16.msra.mxu1 %v306_v5  ;;  %v272_v15 = vld [vmem:[%s470_s4] ss:$0 sm:$0xff]  ;;  %s259_s22 = sshll.u32 %s401_s2, 4  ;;  %s260_s22 = int_to_ptr.vmem [resolvable:$true] %s259_s22 }
  0x2c   :  { %291 = vmatprep.subr.bf16.mxu1 %v399_v1  ;;  %v276_v19 = vld [vmem:[%s471_s5] ss:$0 sm:$0xff]  ;;  %s368_s4 = scalar_lea.vmem %s260_s22, 16  ;;  %s372_s23 = scalar_lea.vmem %s260_s22, 32 }
  0x2d   :  { %v277_v25 = vld [vmem:[#allocation2] ss:$0 sm:$0xff]  ;;  %p369_p1 = scmp.ne.s32.totalorder %s260_s22, %s368_s4  ;;  %p373_p2 = scmp.lt.s32.totalorder %s260_s22, %s260_s22 }
  0x2e   :  { %286 = vmatmul.mubr.msk.bf16.vlgmr.msra.gmra.mxu0 %vm86_vm1, %v70_v4  ;;  %p374_p3 = scmp.lt.s32.totalorder %s372_s23, %s368_s4 }
  0x2f   :  { %292 = vmatpush3.bf16.msra.mxu1 %v307_v6 }
  0x30   :  { %p375_p4 = por %p374_p3, %p373_p2 }
  0x32   :  { %p376_p5 = pnand %p375_p4, %p369_p1 }
  0xee   :  { %v124_v8 = vpop.f32.mrf.mxu0 }
  0xef   :  { %v125_v9 = vadd.f32 %v269_v7, %v124_v8 }
  0xf0   :  { %v287_v10 = vpop.f32.mrf.mxu0 }
  0xf1   :  { %v130_v11 = vmax.f32 %v125_v9, 0.0 }
  0xf2   :  { %v127_v12 = vpop.f32.mrf.mxu0 }
  0xf3   :  { %v131_v13 = vpack.c.bf16 %v130_v11, %v130_v11 }
  0xf4   :  { %v288_v14 = vpop.f32.mrf.mxu0 }
  0xf5   :  { %294 = vmatmul.mubr.msk.bf16.vlgmr.msra.gmra.mxu1 %vm155_vm2, %v131_v13 }
 0x1b5   :  { %v193_v16 = vpop.f32.mrf.mxu1 }
 0x1b6   :  { %v194_v17 = vadd.f32 %v272_v15, %v193_v16 }
 0x1b7   :  { %v295_v18 = vpop.f32.mrf.mxu1 }
 0x1b8   :  { %v199_v20 = vmax.f32 %v194_v17, 0.0 }
 0x1b9   :  { %v196_v21 = vpop.f32.mrf.mxu1 }
 0x1ba   :  { %v207_v22 = vmul.f32 %v276_v19, %v199_v20 }
 0x1bb   :  { %v296_v23 = vpop.f32.mrf.mxu1 }
 0x1bc   :  { %v208_v24 = vsel %vm155_vm2, %v207_v22, 0.0 }
 0x1bd   :  { %209 = vadd.xlane.f32.xlu0 %v208_v24 }
 0x246   :  { %v210_v26 = vpop.xlane.xlu0 %209 }
 0x247   :  { %v218_v27 = vadd.f32 %v277_v25, %v210_v26 }
 0x249   :  { %219 = vxpose.xlu0.b32.start.end [1/1] (short) (narrow) %v218_v27, 8 }
 0x2c5   :  { %v235_v28 = vpop.trf.xlu0 }
 0x2c6   :  { %252 = vst.msk [vmem:[#allocation9] sm:$0x1] %vm251_vm3, %v235_v28 }
 0x2c7   :  { %379 = shalt.err (!%p376_p5)
}
 0x2c8   :  { %262 = dma.vmem_to_hbm [thread:$0]  %s260_s22, 16, %s473_s7, [#allocation5]  }
 0x2c9   :  { %392 = dma.done.wait [#allocation5], 16  }
 0x2ca   :  { %393 = vsyncadd [#allocation5], 4294967280 }
 0x2cb   :  { %266 = vsyncpa [#allocation4], 1 }
 0x2cc   :  { %267 = vsyncpa [#allocation7], 1 }
 0x2cd   :  { %268 = vsyncpa [#allocation5], 1 }

</bundles_post_ra>
